<compile_context>
chip_gen: v6e
topology: v6e:2x2x1
jax: 0.10.0
libtpu: 0.0.40
codegen_flags: <defaults>
</compile_context>

<pallas_src>
import jax
import jax.numpy as jnp
from jax.experimental import pallas as pl
from jax.experimental.pallas import tpu as pltpu


def mv_kernel(slab_ref, o_ref):
    # slab_ref: (4, 4) f32 packed operand
    #   slab[0:3, 0:3] = weight.T   (Wt[j, i] = W[i, j])
    #   slab[3,   0:3] = bias
    #   slab[0:3, 3]   = x
    #   slab[3,   3]   = 1.0
    #
    # torch.mv(W, x)[i] + b[i] = sum_j Wt[j, i] * x[j] + bias[i] * 1.0
    #                          = sum over the 4 sublane rows of (data * mult)
    s = slab_ref[...]                                   # single tiny VMEM load
    prod = s[:, 0:3] * s[:, 3:4]                        # (4, 3) VALU broadcast-mul
    o_ref[...] = jnp.sum(prod, axis=0, keepdims=True)   # XLU sublane reduce -> (1, 3)


@jax.jit
def my_test_linear(x, weight, bias):
    """x: (3,) f32, weight: (3, 3) f32, bias: (1, 3) f32 -> (1, 3) f32."""
    x = jnp.asarray(x, jnp.float32)
    weight = jnp.asarray(weight, jnp.float32)
    bias = jnp.asarray(bias, jnp.float32)

    # One-time layout plumbing, fused by XLA outside the kernel: pack W^T, x,
    # bias (+ multiplier 1.0 for the bias row) into a single (4, 4) slab so the
    # pallas_call prologue issues exactly one input DMA.
    top = jnp.concatenate([weight.T, x.reshape(3, 1)], axis=1)                  # (3, 4)
    bot = jnp.concatenate([bias.reshape(1, 3), jnp.ones((1, 1), jnp.float32)],
                          axis=1)                                               # (1, 4)
    slab = jnp.concatenate([top, bot], axis=0)                                  # (4, 4)

    return pl.pallas_call(
        mv_kernel,
        out_shape=jax.ShapeDtypeStruct((1, 3), jnp.float32),
        in_specs=[pl.BlockSpec(memory_space=pltpu.MemorySpace.VMEM)],
        out_specs=pl.BlockSpec(memory_space=pltpu.MemorySpace.VMEM),
        # 12 muls + 9 sum-adds (incl. folded bias) ~= 18-21 FLOPs; 64 B in + 12 B out.
        cost_estimate=pl.CostEstimate(flops=21, transcendentals=0,
                                      bytes_accessed=76),
    )(slab)


if __name__ == "__main__":
    # Parameters exactly as in MyTestLinear.__init__: identity weight, ones bias.
    weight = jnp.eye(3, dtype=jnp.float32)
    bias = jnp.ones((1, 3), dtype=jnp.float32)

    # Deterministic length-3 input vector (what torch.mv requires).
    key = jax.random.PRNGKey(0)
    x = jax.random.normal(key, (3,), dtype=jnp.float32)

    out = jax.block_until_ready(my_test_linear(x, weight, bias))

    # Pure-JAX reference of the PyTorch forward.
    ref = (weight @ x) + bias          # (3,) + (1, 3) broadcast -> (1, 3)
    assert out.shape == (1, 3)
    assert jnp.allclose(out, ref, atol=1e-6), (out, ref)

    print("KERNEL_OK")
</pallas_src>

<mosaic_0001>
module attributes {stable_mosaic.version = 11 : i64} {
  func.func @mv_kernel(%arg0: memref<4x4xf32, #tpu.memory_space<vmem>>, %arg1: memref<1x3xf32, #tpu.memory_space<vmem>>) attributes {dimension_semantics = [], scalar_prefetch = 0 : i64, scratch_operands = 0 : i64, tpu.core_type = #tpu.core_type<tc>} {
    %c0 = arith.constant 0 : index
    %c0_0 = arith.constant 0 : index
    %0 = vector.load %arg0[%c0, %c0_0] : memref<4x4xf32, #tpu.memory_space<vmem>>, vector<4x4xf32>
    %1 = vector.extract_strided_slice %0 {offsets = [0, 0], sizes = [4, 3], strides = [1, 1]} : vector<4x4xf32> to vector<4x3xf32>
    %2 = vector.extract_strided_slice %0 {offsets = [0, 3], sizes = [4, 1], strides = [1, 1]} : vector<4x4xf32> to vector<4x1xf32>
    %3 = vector.broadcast %2 : vector<4x1xf32> to vector<4x3xf32>
    %4 = arith.mulf %1, %3 : vector<4x3xf32>
    %cst = arith.constant dense<0.000000e+00> : vector<3xf32>
    %5 = vector.multi_reduction <add>, %4, %cst [0] : vector<4x3xf32> to vector<3xf32>
    %6 = vector.shape_cast %5 : vector<3xf32> to vector<1x3xf32>
    %c0_1 = arith.constant 0 : index
    %c0_2 = arith.constant 0 : index
    %7 = vector.load %arg1[%c0_1, %c0_2] : memref<1x3xf32, #tpu.memory_space<vmem>>, vector<1x3xf32>
    tpu.vector_store %arg1[%c0_1, %c0_2], %6 {strides = array<i32>} : memref<1x3xf32, #tpu.memory_space<vmem>>, vector<1x3xf32>,
    return
  }
}

</mosaic_0001>

<bundles_post_ra>
// kernel: my_test_linear.1
= control target key start
LH: loop header
LB: loop body
LE: loop exit
PB: predicated region body
PF: predicated region fallthrough
CT: control target
= control target key end

     0   :  { %s83_s0 = inlined_call_operand.vmem [shape: f32[4,4], index: 0, kind: input, shape index: {}]   ;;  %s84_s1 = inlined_call_operand.hbm [shape: f32[1,3], index: 1, kind: output, shape index: {}]  }
   0x1   :  { %v9_v0 = vld [vmem:[%s83_s0] sm:$0xf] }
   0x2   :  { %6 = vsyncpa [#allocation3], 0  ;;  %v65_v1 = vmov 3   ;;  %vm16_vm0 = vcmask 19456   ;;  %s66_s8 = smov [#allocation2]   ;;  %vm24_vm1 = vcmask 16384  }
   0x3   :  { %42 = vset.pattern.permute.xlu0 %v65_v1  ;;  %s32_s9 = sshll.u32 %s66_s8, 4  ;;  %s33_s9 = int_to_ptr.vmem [resolvable:$true] %s32_s9 }
   0x4   :  { %12 = vperm.xlu0 %42, %v9_v0   ;;  %s43_s0 = scalar_lea.vmem %s33_s9, 16  ;;  %s47_s10 = scalar_lea.vmem %s33_s9, 32 }
   0x5   :  { %p44_p0 = scmp.ne.s32.totalorder %s33_s9, %s43_s0  ;;  %p48_p1 = scmp.lt.s32.totalorder %s33_s9, %s33_s9 }
   0x6   :  { %p49_p2 = scmp.lt.s32.totalorder %s47_s10, %s43_s0 }
   0x8   :  { %p50_p3 = por %p49_p2, %p48_p1 }
   0xa   :  { %p51_p4 = pnand %p50_p3, %p44_p0 }
  0x7f   :  { %v13_v2 = vpop.permute.xlu0 %12 }
  0x80   :  { %v15_v3 = vmul.f32 %v13_v2, %v9_v0 }
  0x82   :  { %v17_v4 = vsel %vm16_vm0, %v15_v3, 0.0 }
  0x83   :  { %v18_v5 = vrot.slane %v17_v4, 4 }
  0x85   :  { %v19_v6 = vadd.f32 %v18_v5, %v17_v4 }
  0x87   :  { %v20_v7 = vrot.slane %v19_v6, 2 }
  0x89   :  { %v21_v8 = vadd.f32 %v20_v7, %v19_v6 }
  0x8b   :  { %v22_v9 = vrot.slane %v21_v8, 1 }
  0x8d   :  { %v23_v10 = vadd.f32 %v22_v9, %v21_v8 }
  0x8f   :  { %25 = vst.msk [vmem:[#allocation2] sm:$0x1] %vm24_vm1, %v23_v10 }
  0x90   :  { %54 = shalt.err (!%p51_p4)
}
  0x91   :  { %35 = dma.vmem_to_hbm [thread:$0]  %s33_s9, 16, %s84_s1, [#allocation3]  }
  0x92   :  { %63 = dma.done.wait [#allocation3], 16  }
  0x93   :  { %64 = vsyncadd [#allocation3], 4294967280 }
  0x94   :  { %39 = vsyncpa [#allocation3], 1 }

</bundles_post_ra>
